<compile_context>
chip_gen: v7x
topology: tpu7x:2x2x1
jax: 0.10.0
libtpu: 0.0.40
codegen_flags: <defaults>
</compile_context>

<pallas_src>
import jax
import jax.numpy as jnp
from jax.experimental import pallas as pl
from jax.experimental.pallas import tpu as pltpu


def _pick_tile(total, align, max_tile):
    """Largest multiple of `align` that divides `total` and is <= max_tile; else the full dim."""
    best = None
    t = align
    while t <= min(total, max_tile):
        if total % t == 0:
            best = t
        t += align
    return best if best is not None else total


# ---------------- Pass 1: per-(n, c) spatial sum ----------------
def _sum_rows_kernel(x_ref, s_ref):
    # x_ref: (TR, THW) tile of (N*C, H*W); s_ref: (TR, 1) resident f32 accumulator.
    @pl.when(pl.program_id(1) == 0)
    def _():
        s_ref[...] = jnp.zeros_like(s_ref)

    s_ref[...] += jnp.sum(x_ref[...].astype(jnp.float32), axis=-1, keepdims=True)


# ---------------- Pass 2: tiny MLP gate (mean -> fc1 -> relu -> fc2 -> sigmoid) -------
def _make_gate_kernel(inv_hw):
    def _gate_kernel(sums_ref, w1_ref, b1_ref, w2_ref, b2_ref, att_ref):
        # sums_ref: (N, C) spatial sums; weights stored as (in, out).
        pooled = sums_ref[...] * inv_hw                                   # (N, C) mean
        h = jnp.dot(pooled, w1_ref[...], preferred_element_type=jnp.float32) + b1_ref[...]
        h = jnp.maximum(h, 0.0)                                           # relu
        logits = jnp.dot(h, w2_ref[...], preferred_element_type=jnp.float32) + b2_ref[...]
        att_ref[...] = jax.nn.sigmoid(logits)                             # (N, C)
    return _gate_kernel


# ---------------- Pass 3: elementwise gating ----------------
def _scale_kernel(x_ref, a_ref, o_ref):
    # x_ref: (TR, THW), a_ref: (TR, 1) gate broadcast over lanes (cheap lane bcast).
    o_ref[...] = (x_ref[...].astype(jnp.float32) * a_ref[...]).astype(o_ref.dtype)


def channel_attention(x, w1, b1, w2, b2):
    """x: (N, C, H, W); w1: (C, C//4), b1: (1, C//4), w2: (C//4, C), b2: (1, C)."""
    n, c, h, w = x.shape
    hid = w1.shape[1]
    hw = h * w
    rows = n * c
    x2d = x.reshape(rows, hw)           # contiguous reshape: metadata only

    # Lane-dense tiles: sublane tile multiple of 8 (<=256), lane tile multiple of
    # 128 (<=2048) -> worst-case ~2 MiB f32 block; in+out double-buffered ~8 MiB.
    tr = _pick_tile(rows, 8, 256)
    thw = _pick_tile(hw, 128, 2048)
    grid = (rows // tr, hw // thw)

    # Pass 1: spatial sums, HW reduction axis last ("arbitrary"), rows "parallel".
    sums = pl.pallas_call(
        _sum_rows_kernel,
        out_shape=jax.ShapeDtypeStruct((rows, 1), jnp.float32),
        grid=grid,
        in_specs=[pl.BlockSpec((tr, thw), lambda i, j: (i, j))],
        out_specs=pl.BlockSpec((tr, 1), lambda i, j: (i, 0)),
        compiler_params=pltpu.CompilerParams(
            dimension_semantics=("parallel", "arbitrary")),
    )(x2d)

    # Pass 2: tiny gate MLP on (N, C) — single block, MXU matmuls.
    att = pl.pallas_call(
        _make_gate_kernel(1.0 / float(hw)),
        out_shape=jax.ShapeDtypeStruct((n, c), jnp.float32),
        in_specs=[
            pl.BlockSpec((n, c), lambda: (0, 0)),
            pl.BlockSpec((c, hid), lambda: (0, 0)),
            pl.BlockSpec((1, hid), lambda: (0, 0)),
            pl.BlockSpec((hid, c), lambda: (0, 0)),
            pl.BlockSpec((1, c), lambda: (0, 0)),
        ],
        out_specs=pl.BlockSpec((n, c), lambda: (0, 0)),
    )(sums.reshape(n, c), w1, b1, w2, b2)

    # Pass 3: out = x * att, fully parallel streaming pass (megacore-shardable).
    out2d = pl.pallas_call(
        _scale_kernel,
        out_shape=jax.ShapeDtypeStruct((rows, hw), x.dtype),
        grid=grid,
        in_specs=[
            pl.BlockSpec((tr, thw), lambda i, j: (i, j)),
            pl.BlockSpec((tr, 1), lambda i, j: (i, 0)),
        ],
        out_specs=pl.BlockSpec((tr, thw), lambda i, j: (i, j)),
        compiler_params=pltpu.CompilerParams(
            dimension_semantics=("parallel", "parallel")),
    )(x2d, att.reshape(rows, 1))

    return out2d.reshape(n, c, h, w)


def _reference(x, w1, b1, w2, b2):
    # Pure-JAX reference mirroring the PyTorch forward.
    pooled = jnp.mean(x, axis=(2, 3))                    # (N, C)
    hmid = jax.nn.relu(pooled @ w1 + b1[0])              # (N, C//4)
    att = jax.nn.sigmoid(hmid @ w2 + b2[0])              # (N, C)
    return x * att[:, :, None, None]


if __name__ == "__main__":
    N, C, H, W = 2, 8, 16, 16
    HID = C // 4

    key = jax.random.PRNGKey(0)
    kx, kw1, kb1, kw2, kb2 = jax.random.split(key, 5)

    x = jax.random.normal(kx, (N, C, H, W), dtype=jnp.float32)

    # nn.Linear(in, out): weight (out, in), y = x @ W.T + b. We store (in, out)
    # transposed weights directly, with the PyTorch default uniform init bounds.
    bound1 = 1.0 / (C ** 0.5)
    w1 = jax.random.uniform(kw1, (C, HID), jnp.float32, -bound1, bound1)
    b1 = jax.random.uniform(kb1, (1, HID), jnp.float32, -bound1, bound1)
    bound2 = 1.0 / (HID ** 0.5)
    w2 = jax.random.uniform(kw2, (HID, C), jnp.float32, -bound2, bound2)
    b2 = jax.random.uniform(kb2, (1, C), jnp.float32, -bound2, bound2)

    out = channel_attention(x, w1, b1, w2, b2)
    out = jax.block_until_ready(out)

    ref = _reference(x, w1, b1, w2, b2)
    assert out.shape == (N, C, H, W)
    assert jnp.allclose(out, ref, atol=1e-5, rtol=1e-5)

    print("KERNEL_OK")
</pallas_src>

<mosaic_0001>
module attributes {stable_mosaic.version = 11 : i64} {
  func.func @_sum_rows_kernel(%arg0: i32, %arg1: i32, %arg2: memref<16x256xf32, #tpu.memory_space<vmem>>, %arg3: memref<16x1xf32, #tpu.memory_space<vmem>>) attributes {dimension_semantics = [#tpu.dimension_semantics<parallel>, #tpu.dimension_semantics<arbitrary>], iteration_bounds = array<i64: 1, 1>, scalar_prefetch = 0 : i64, scratch_operands = 0 : i64, tpu.core_type = #tpu.core_type<tc>, window_params = [{transform_indices = @transform_0, window_bounds = array<i64: 16, 256>}, {transform_indices = @transform_1, window_bounds = array<i64: 16, 1>}]} {
    %c0_i32 = arith.constant 0 : i32
    %0 = arith.cmpi eq, %arg1, %c0_i32 : i32
    %1 = arith.extui %0 : i1 to i32
    %c0_i32_0 = arith.constant 0 : i32
    %2 = arith.cmpi ne, %1, %c0_i32_0 : i32
    scf.if %2 {
      %cst_6 = arith.constant 0.000000e+00 : f32
      %9 = vector.broadcast %cst_6 : f32 to vector<16x1xf32>
      %c0_7 = arith.constant 0 : index
      %c0_8 = arith.constant 0 : index
      %10 = vector.load %arg3[%c0_7, %c0_8] : memref<16x1xf32, #tpu.memory_space<vmem>>, vector<16x1xf32>
      tpu.vector_store %arg3[%c0_7, %c0_8], %9 {strides = array<i32>} : memref<16x1xf32, #tpu.memory_space<vmem>>, vector<16x1xf32>,
    } else {
    }
    %c0 = arith.constant 0 : index
    %c0_1 = arith.constant 0 : index
    %3 = vector.load %arg3[%c0, %c0_1] : memref<16x1xf32, #tpu.memory_space<vmem>>, vector<16x1xf32>
    %c0_2 = arith.constant 0 : index
    %c0_3 = arith.constant 0 : index
    %4 = vector.load %arg2[%c0_2, %c0_3] : memref<16x256xf32, #tpu.memory_space<vmem>>, vector<16x256xf32>
    %cst = arith.constant dense<0.000000e+00> : vector<16xf32>
    %5 = vector.multi_reduction <add>, %4, %cst [1] : vector<16x256xf32> to vector<16xf32>
    %6 = vector.shape_cast %5 : vector<16xf32> to vector<16x1xf32>
    %7 = arith.addf %3, %6 : vector<16x1xf32>
    %c0_4 = arith.constant 0 : index
    %c0_5 = arith.constant 0 : index
    %8 = vector.load %arg3[%c0_4, %c0_5] : memref<16x1xf32, #tpu.memory_space<vmem>>, vector<16x1xf32>
    tpu.vector_store %arg3[%c0_4, %c0_5], %7 {strides = array<i32>} : memref<16x1xf32, #tpu.memory_space<vmem>>, vector<16x1xf32>,
    return
  }
  func.func @transform_0(%arg0: i32, %arg1: i32) -> (i32, i32) {
    %c0_i32 = arith.constant 0 : i32
    return %arg0, %arg1 : i32, i32
  }
  func.func @transform_1(%arg0: i32, %arg1: i32) -> (i32, i32) {
    %c0_i32 = arith.constant 0 : i32
    %c0_i32_0 = arith.constant 0 : i32
    return %arg0, %c0_i32 : i32, i32
  }
}

</mosaic_0001>

<bundles_post_ra>
// kernel: tpu_custom_call.1
= control target key start
LH: loop header
LB: loop body
LE: loop exit
PB: predicated region body
PF: predicated region fallthrough
CT: control target
= control target key end

     0   :  { %6 = vsyncpa [#allocation3], 0  ;;  %s79_s6 = smov [#allocation2]   ;;  %s127_s0 = inlined_call_operand.hbm [shape: f32[16,256], index: 0, kind: input, shape index: {}]   ;;  %s128_s1 = inlined_call_operand.vmem [shape: f32[16,1], index: 1, kind: output, shape index: {}]  }
   0x1   :  { %s12_s7 = sshll.u32 %s79_s6, 4  ;;  %s55_s10 = scalar_lea.hbm %s127_s0, 512  ;;  %s13_s7 = int_to_ptr.vmem [resolvable:$true] %s12_s7 }
   0x2   :  { %p56_p0 = scmp.ne.s32.totalorder %s127_s0, %s55_s10  ;;  %p59_p1 = scmp.lt.u32.totalorder %s55_s10, %s127_s0 }
   0x4   :  { %p61_p2 = pnand %p59_p1, %p56_p0 }
   0x6   :  { %64 = shalt.err (!%p61_p2)
}
   0x7   :  { %s65_s15 = scalar_lea.vmem %s13_s7, 512  ;;  %p70_p4 = scmp.lt.s32.totalorder %s13_s7, %s13_s7 }
   0x8   :  { %p66_p3 = scmp.ne.s32.totalorder %s13_s7, %s65_s15  ;;  %p71_p5 = scmp.lt.s32.totalorder %s65_s15, %s65_s15 }
   0xa   :  { %p72_p6 = por %p71_p5, %p70_p4 }
   0xc   :  { %p73_p7 = pnand %p72_p6, %p66_p3 }
   0xe   :  { %76 = shalt.err (!%p73_p7)
}
   0xf   :  { %s80_s16 = smov 256   ;;  %s81_s17 = smov 16  }
  0x10   :  { %18 = dma.hbm_to_vmem [thread:$0]  %s127_s0, 512, %s13_s7, [#allocation3], %s80_s16, %s80_s16, %s81_s17  }
  0x11   :  { %77 = dma.done.wait [#allocation3], 512  }
  0x12   :  { %78 = vsyncadd [#allocation3], 4294966784  ;;  %vm26_vm0 = vcmask 7168   ;;  %v82_v0 = vmov 0.0   ;;  %v31_v1 = vld [vmem:[#allocation2] sm:$0xff]  ;;  %v32_v2 = vld [vmem:[#allocation2 + $0x8] sm:$0xff] }
  0x13   :  { %27 = vst.msk [vmem:[%s128_s1] sm:$0xff] %vm26_vm0, %v82_v0  ;;  %28 = vst.msk [vmem:[%s128_s1 + $0x8] sm:$0xff] %vm26_vm0, %v82_v0  ;;  %v33_v3 = vld [vmem:[#allocation2 + $0x10] sm:$0xff]  ;;  %v35_v4 = vadd.f32 %v32_v2, %v31_v1  ;;  %v34_v5 = vld [vmem:[#allocation2 + $0x18] sm:$0xff] }
  0x14   :  { %v38_v6 = vadd.f32 %v34_v5, %v33_v3 }
  0x15   :  { %36 = vadd.xlane.f32.xlu0 %v35_v4 }
  0x19   :  { %39 = vadd.xlane.f32.xlu0 %v38_v6 }
  0x1a   :  { %v29_v7 = vld [vmem:[%s128_s1] sm:$0xff]  ;;  %v30_v10 = vld [vmem:[%s128_s1 + $0x8] sm:$0xff] }
  0xa2   :  { %v37_v8 = vpop.xlane.xlu0 %36 }
  0xa3   :  { %v41_v9 = vadd.f32 %v37_v8, %v29_v7 }
  0xa5   :  { %44 = vst.msk [vmem:[%s128_s1] sm:$0xff] %vm26_vm0, %v41_v9 }
  0xa6   :  { %v40_v11 = vpop.xlane.xlu0 %39 }
  0xa7   :  { %v42_v12 = vadd.f32 %v40_v11, %v30_v10 }
  0xa9   :  { %45 = vst.msk [vmem:[%s128_s1 + $0x8] sm:$0xff] %vm26_vm0, %v42_v12 }
  0xaa   :  { %50 = vsyncpa [#allocation3], 1 }

</bundles_post_ra>
